<compile_context>
chip_gen: v5e
topology: v5e:2x2
jax: 0.10.0
libtpu: 0.0.40
codegen_flags: <defaults>
</compile_context>

<pallas_src>
import functools

import jax
import jax.numpy as jnp
import numpy as np
from jax.experimental import pallas as pl
from jax.experimental.pallas import tpu as pltpu


# ----------------------------- Pallas kernel -------------------------------

def _focal_loss_kernel(x_ref, t_ref, o_ref, *, alpha, gamma, n_valid, tb):
    """One batch-tile (lane-dense: classes on sublanes, batch on lanes)."""
    i = pl.program_id(0)
    C = x_ref.shape[0]

    x = x_ref[...].astype(jnp.float32)                       # (C, tb)
    t = t_ref[...]                                           # (1, tb) int32

    # Lane validity for the (possibly partial) boundary tile.  Applied BEFORE
    # exp so undefined tail data can never turn into NaN/inf.
    lane = jax.lax.broadcasted_iota(jnp.int32, (1, tb), 1) + i * tb
    valid = lane < n_valid                                   # (1, tb) bool
    x = jnp.where(valid, x, 0.0)                             # (C, tb)

    # Log-softmax pieces, reduced over the class (sublane) axis.
    m = jnp.max(x, axis=0, keepdims=True)                    # (1, tb)
    e = jnp.exp(x - m)                                       # (C, tb) (only
    denom = jnp.sum(e, axis=0, keepdims=True)                #  mandatory exp)

    # Only the target class survives the one-hot multiply -> pick x_t directly.
    cls = jax.lax.broadcasted_iota(jnp.int32, (C, tb), 0)
    x_t = jnp.sum(jnp.where(cls == t, x, 0.0), axis=0, keepdims=True)  # (1, tb)

    logp_t = (x_t - m) - jnp.log(denom)                      # (1, tb)
    p_t = jnp.exp(logp_t)                                    # (1, tb)

    one_minus = 1.0 - p_t
    # gamma is a static Python value: integer gamma never lowers via exp/log.
    if isinstance(gamma, (int, np.integer)) or float(gamma).is_integer():
        g = int(gamma)
        if g == 2:
            w = one_minus * one_minus
        else:
            w = one_minus ** g                               # integer_pow
    else:
        w = one_minus ** gamma                               # true pow (EUP)

    row_loss = alpha * w * (-logp_t)                         # (1, tb)
    row_loss = jnp.where(valid, row_loss, 0.0)

    partial = jnp.sum(row_loss)                              # scalar

    # Per-tile partial sum in lane 0 of this tile's own output block
    # (grid axis is "parallel": no cross-step accumulator dependence).
    lane_out = jax.lax.broadcasted_iota(jnp.int32, (1, 128), 1)
    o_ref[...] = jnp.where(lane_out == 0, partial, 0.0).astype(o_ref.dtype)


# ------------------------------ Host wrapper --------------------------------

def _round_up(x, m):
    return (x + m - 1) // m * m


def focal_loss(logits, targets, alpha=0.25, gamma=2, tb=None,
               block_bytes=2 * 1024 * 1024):
    """Fused Pallas focal loss.  logits:(B,C) float, targets:(B,) int."""
    B, C = logits.shape

    # Lane-dense repack (layout plumbing only; no cast, no pad):
    # batch -> 128-lane axis, classes -> sublanes.
    x = jnp.transpose(logits)                   # (C, B), native dtype
    t = targets.astype(jnp.int32).reshape(1, B)

    if tb is None:
        # VMEM-aware tile: keep a single input block at ~block_bytes so the
        # double-buffered working set plus in-kernel temps stays well inside
        # scoped VMEM on every chip (v5e/v6e/v7x).
        bytes_per_sample = C * jnp.dtype(logits.dtype).itemsize + 4
        tb = max(128, block_bytes // bytes_per_sample)
    tb = max(128, (int(tb) // 128) * 128)
    tb = min(tb, _round_up(B, 128))
    grid = (B + tb - 1) // tb                   # no host-side padding

    # NOTE: B (and hence n_valid) is a static shape, so baking it into the
    # kernel adds no recompiles beyond what jit already does per batch size.
    partials = pl.pallas_call(
        functools.partial(_focal_loss_kernel, alpha=float(alpha), gamma=gamma,
                          n_valid=B, tb=tb),
        out_shape=jax.ShapeDtypeStruct((1, grid * 128), jnp.float32),
        grid=(grid,),
        in_specs=[
            pl.BlockSpec((C, tb), lambda i: (0, i)),
            pl.BlockSpec((1, tb), lambda i: (0, i)),
        ],
        out_specs=pl.BlockSpec((1, 128), lambda i: (0, i)),
        compiler_params=pltpu.CompilerParams(
            dimension_semantics=("parallel",),
            vmem_limit_bytes=48 * 1024 * 1024),
    )(x, t)

    # .mean() over the true batch size (partials are zero outside lane 0).
    return jnp.sum(partials) / B


# --------------------------- pure-JAX reference -----------------------------

def reference_focal_loss(logits, targets, alpha=0.25, gamma=2, num_classes=2):
    p = jax.nn.softmax(logits.astype(jnp.float32), axis=1)
    onehot = jax.nn.one_hot(targets, num_classes, dtype=jnp.float32)
    ce = -onehot * jnp.log(p)
    fl = alpha * (1.0 - p) ** gamma * ce
    return fl.sum(axis=1).mean()


# ----------------------------------- main ------------------------------------

if __name__ == "__main__":
    num_classes = 2                         # ['abnormal160', 'normal160']

    key = jax.random.PRNGKey(0)
    k1, k2, k3, k4 = jax.random.split(key, 4)

    # Small case: batch=8 (single tile, heavily masked lanes).
    batch = 8
    logits = jax.random.normal(k1, (batch, num_classes), jnp.float32)
    targets = jax.random.randint(k2, (batch,), 0, num_classes, jnp.int32)

    loss = jax.block_until_ready(jax.jit(focal_loss)(logits, targets))
    ref = jax.block_until_ready(reference_focal_loss(logits, targets,
                                                     num_classes=num_classes))
    np.testing.assert_allclose(np.asarray(loss), np.asarray(ref),
                               rtol=1e-5, atol=1e-5)

    # Ragged, multi-tile case: batch=300 with a forced 128-lane tile ->
    # parallel per-tile partials + boundary-lane masking both exercised.
    batch2 = 300
    logits2 = jax.random.normal(k3, (batch2, num_classes), jnp.float32)
    targets2 = jax.random.randint(k4, (batch2,), 0, num_classes, jnp.int32)

    loss2 = jax.block_until_ready(
        jax.jit(functools.partial(focal_loss, tb=128))(logits2, targets2))
    ref2 = jax.block_until_ready(reference_focal_loss(logits2, targets2,
                                                      num_classes=num_classes))
    np.testing.assert_allclose(np.asarray(loss2), np.asarray(ref2),
                               rtol=1e-5, atol=1e-5)

    print("KERNEL_OK")
</pallas_src>

<mosaic_0001>
module attributes {stable_mosaic.version = 11 : i64} {
  func.func @_focal_loss_kernel(%arg0: i32, %arg1: memref<2x128xf32, #tpu.memory_space<vmem>>, %arg2: memref<1x128xi32, #tpu.memory_space<vmem>>, %arg3: memref<1x128xf32, #tpu.memory_space<vmem>>) attributes {dimension_semantics = [#tpu.dimension_semantics<parallel>], iteration_bounds = array<i64: 1>, scalar_prefetch = 0 : i64, scratch_operands = 0 : i64, tpu.core_type = #tpu.core_type<tc>, window_params = [{transform_indices = @transform_0, window_bounds = array<i64: 2, 128>}, {transform_indices = @transform_1, window_bounds = array<i64: 1, 128>}, {transform_indices = @transform_2, window_bounds = array<i64: 1, 128>}]} {
    %c0 = arith.constant 0 : index
    %c0_0 = arith.constant 0 : index
    %0 = vector.load %arg1[%c0, %c0_0] : memref<2x128xf32, #tpu.memory_space<vmem>>, vector<2x128xf32>
    %c0_1 = arith.constant 0 : index
    %c0_2 = arith.constant 0 : index
    %1 = vector.load %arg2[%c0_1, %c0_2] : memref<1x128xi32, #tpu.memory_space<vmem>>, vector<1x128xi32>
    %2 = tpu.iota {dimensions = array<i32: 1>} : vector<1x128xi32>
    %c128_i32 = arith.constant 128 : i32
    %3 = arith.muli %arg0, %c128_i32 : i32
    %4 = vector.broadcast %3 : i32 to vector<1x128xi32>
    %5 = arith.addi %2, %4 : vector<1x128xi32>
    %c8_i32 = arith.constant 8 : i32
    %6 = vector.broadcast %c8_i32 : i32 to vector<1x128xi32>
    %7 = arith.cmpi slt, %5, %6 : vector<1x128xi32>
    %cst = arith.constant 0.000000e+00 : f32
    %8 = vector.shape_cast %7 : vector<1x128xi1> to vector<1x128xi1>
    %9 = vector.broadcast %8 : vector<1x128xi1> to vector<2x128xi1>
    %10 = vector.broadcast %cst : f32 to vector<2x128xf32>
    %11 = arith.select %9, %0, %10 : vector<2x128xi1>, vector<2x128xf32>
    %cst_3 = arith.constant dense<0xFF800000> : vector<128xf32>
    %12 = vector.multi_reduction <maximumf>, %11, %cst_3 [0] : vector<2x128xf32> to vector<128xf32>
    %13 = vector.shape_cast %12 : vector<128xf32> to vector<1x128xf32>
    %14 = vector.broadcast %13 : vector<1x128xf32> to vector<2x128xf32>
    %15 = arith.subf %11, %14 : vector<2x128xf32>
    %16 = math.exp %15 : vector<2x128xf32>
    %cst_4 = arith.constant dense<0.000000e+00> : vector<128xf32>
    %17 = vector.multi_reduction <add>, %16, %cst_4 [0] : vector<2x128xf32> to vector<128xf32>
    %18 = vector.shape_cast %17 : vector<128xf32> to vector<1x128xf32>
    %19 = tpu.iota {dimensions = array<i32: 0>} : vector<2x128xi32>
    %20 = vector.broadcast %1 : vector<1x128xi32> to vector<2x128xi32>
    %21 = arith.cmpi eq, %19, %20 : vector<2x128xi32>
    %cst_5 = arith.constant 0.000000e+00 : f32
    %22 = vector.broadcast %cst_5 : f32 to vector<2x128xf32>
    %23 = arith.select %21, %11, %22 : vector<2x128xi1>, vector<2x128xf32>
    %cst_6 = arith.constant dense<0.000000e+00> : vector<128xf32>
    %24 = vector.multi_reduction <add>, %23, %cst_6 [0] : vector<2x128xf32> to vector<128xf32>
    %25 = vector.shape_cast %24 : vector<128xf32> to vector<1x128xf32>
    %26 = arith.subf %25, %13 : vector<1x128xf32>
    %27 = math.log %18 : vector<1x128xf32>
    %28 = arith.subf %26, %27 : vector<1x128xf32>
    %29 = math.exp %28 : vector<1x128xf32>
    %cst_7 = arith.constant 1.000000e+00 : f32
    %30 = vector.broadcast %cst_7 : f32 to vector<1x128xf32>
    %31 = arith.subf %30, %29 : vector<1x128xf32>
    %32 = arith.mulf %31, %31 : vector<1x128xf32>
    %cst_8 = arith.constant 2.500000e-01 : f32
    %33 = vector.broadcast %cst_8 : f32 to vector<1x128xf32>
    %34 = arith.mulf %33, %32 : vector<1x128xf32>
    %cst_9 = arith.constant 0.000000e+00 : f32
    %35 = vector.broadcast %cst_9 : f32 to vector<1x128xf32>
    %36 = arith.subf %35, %28 : vector<1x128xf32>
    %37 = arith.mulf %34, %36 : vector<1x128xf32>
    %cst_10 = arith.constant 0.000000e+00 : f32
    %38 = vector.broadcast %cst_10 : f32 to vector<1x128xf32>
    %39 = arith.select %7, %37, %38 : vector<1x128xi1>, vector<1x128xf32>
    %40 = vector.shape_cast %39 : vector<1x128xf32> to vector<1x1x128xf32>
    %cst_11 = arith.constant dense<0.000000e+00> : vector<1xf32>
    %41 = vector.multi_reduction <add>, %40, %cst_11 [1, 2] : vector<1x1x128xf32> to vector<1xf32>
    %42 = vector.shape_cast %41 : vector<1xf32> to vector<1x1x1xf32>
    %43 = vector.extract %42[0, 0, 0] : f32 from vector<1x1x1xf32>
    %44 = tpu.iota {dimensions = array<i32: 1>} : vector<1x128xi32>
    %c0_i32 = arith.constant 0 : i32
    %45 = vector.broadcast %c0_i32 : i32 to vector<1x128xi32>
    %46 = arith.cmpi eq, %44, %45 : vector<1x128xi32>
    %cst_12 = arith.constant 0.000000e+00 : f32
    %47 = vector.broadcast %43 : f32 to vector<1x128xf32>
    %48 = vector.broadcast %cst_12 : f32 to vector<1x128xf32>
    %49 = arith.select %46, %47, %48 : vector<1x128xi1>, vector<1x128xf32>
    %c0_13 = arith.constant 0 : index
    %c0_14 = arith.constant 0 : index
    %50 = vector.load %arg3[%c0_13, %c0_14] : memref<1x128xf32, #tpu.memory_space<vmem>>, vector<1x128xf32>
    tpu.vector_store %arg3[%c0_13, %c0_14], %49 {strides = array<i32>} : memref<1x128xf32, #tpu.memory_space<vmem>>, vector<1x128xf32>,
    return
  }
  func.func @transform_0(%arg0: i32) -> (i32, i32) {
    %c0_i32 = arith.constant 0 : i32
    %c0_i32_0 = arith.constant 0 : i32
    return %c0_i32, %arg0 : i32, i32
  }
  func.func @transform_1(%arg0: i32) -> (i32, i32) {
    %c0_i32 = arith.constant 0 : i32
    %c0_i32_0 = arith.constant 0 : i32
    return %c0_i32, %arg0 : i32, i32
  }
  func.func @transform_2(%arg0: i32) -> (i32, i32) {
    %c0_i32 = arith.constant 0 : i32
    %c0_i32_0 = arith.constant 0 : i32
    return %c0_i32, %arg0 : i32, i32
  }
}

</mosaic_0001>

<bundles_post_ra>
// kernel: focal_loss.1
= control target key start
LH: loop header
LB: loop body
LE: loop exit
PB: predicated region body
PF: predicated region fallthrough
CT: control target
= control target key end

     0   :  { %7 = vsyncpa [#allocation3], 0  ;;  %s134_s12 = smov [#allocation2]   ;;  %s170_s0 = inlined_call_operand.hbm [shape: f32[2,8], index: 0, kind: input, shape index: {}]   ;;  %s171_s1 = inlined_call_operand.vmem [shape: s32[1,8], index: 1, kind: input, shape index: {}]   ;;  %s172_s2 = inlined_call_operand.vmem [shape: f32[1,128], index: 2, kind: output, shape index: {}]  }
   0x1   :  { %s13_s11 = sshll.u32 %s170_s0, 4  ;;  %s15_s13 = sshll.u32 %s134_s12, 4  ;;  %s14_s11 = int_to_ptr.hbm [resolvable:$true] %s13_s11  ;;  %s16_s13 = int_to_ptr.vmem [resolvable:$true] %s15_s13 }
   0x2   :  { %18 = dma.hbm_to_vmem [thread:$0]  %s14_s11, 32, %s16_s13, [#allocation3]  }
   0x3   :  { %132 = dma.done.wait [#allocation3], 32  }
   0x4   :  { %133 = vsyncadd [#allocation3], 4294967264  ;;  %v27_v0 = vlaneseq  ;;  %vm36_vm1 = vcmask 1041408   ;;  %v25_v2 = vld [vmem:[#allocation2] sm:$0x3]  ;;  %vm78_vm3 = vcmask 1040384  }
   0x5   :  { %v101_v9 = vld [vmem:[%s171_s1] ss:$0 sm:$0xff] }
   0x6   :  { %v153_v1 = vand.u32 127, %v27_v0  ;;  %v55_v8 = vshrl.u32 %v27_v0, 7 }
   0x8   :  { %vm32_vm0 = vcmp.lt.s32.totalorder %v153_v1, 8  ;;  %vm57_vm2 = vcmp.eq.s32.totalorder %v55_v8, %v101_v9  ;;  %vm89_vm4 = vcmp.eq.s32.totalorder %v153_v1, 0 }
   0x9   :  { %v35_v3 = vsel %vm32_vm0, %v25_v2, 0.0 }
   0xa   :  { %v37_v4 = vsel %vm36_vm1, %v35_v3, -inf  ;;  %v58_v13 = vsel %vm57_vm2, %v35_v3, 0.0 }
   0xb   :  { %v38_v5 = vrot.slane %v37_v4, 4  ;;  %v59_v16 = vsel %vm36_vm1, %v58_v13, 0.0 }
   0xc   :  { %v60_v17 = vrot.slane %v59_v16, 4 }
   0xd   :  { %v39_v6 = vmax.f32 %v37_v4, %v38_v5 }
   0xe   :  { %v61_v18 = vadd.f32 %v60_v17, %v59_v16 }
   0xf   :  { %v40_v7 = vrot.slane %v39_v6, 2 }
  0x10   :  { %v62_v22 = vrot.slane %v61_v18, 2 }
  0x11   :  { %v41_v10 = vmax.f32 %v39_v6, %v40_v7 }
  0x12   :  { %v63_v25 = vadd.f32 %v62_v22, %v61_v18 }
  0x13   :  { %v42_v11 = vrot.slane %v41_v10, 1 }
  0x14   :  { %v64_v28 = vrot.slane %v63_v25, 1 }
  0x15   :  { %v43_v12 = vmax.f32 %v41_v10, %v42_v11 }
  0x16   :  { %v65_v30 = vadd.f32 %v64_v28, %v63_v25 }
  0x17   :  { %v44_v14 = vsub.f32 %v35_v3, %v43_v12 }
  0x18   :  { %v66_v31 = vsub.f32 %v65_v30, %v43_v12 }
  0x19   :  { %v45_v15 = vmul.f32 1.442695, %v44_v14 }
  0x1b   :  { %102 = vpow2.f32 %v45_v15 }
  0x21   :  { %v103_v19 = vpop.eup %102 }
  0x22   :  { %v47_v20 = vsel %vm36_vm1, %v103_v19, 0.0 }
  0x23   :  { %v48_v21 = vrot.slane %v47_v20, 4 }
  0x25   :  { %v49_v23 = vadd.f32 %v48_v21, %v47_v20 }
  0x27   :  { %v50_v24 = vrot.slane %v49_v23, 2 }
  0x29   :  { %v51_v26 = vadd.f32 %v50_v24, %v49_v23 }
  0x2b   :  { %v52_v27 = vrot.slane %v51_v26, 1 }
  0x2d   :  { %v53_v29 = vadd.f32 %v52_v27, %v51_v26 }
  0x2f   :  { %104 = vlog2.f32 %v53_v29 }
  0x35   :  { %v105_v32 = vpop.eup %104 }
  0x36   :  { %v68_v33 = vmul.f32 0.6931472, %v105_v32 }
  0x38   :  { %v69_v34 = vsub.f32 %v66_v31, %v68_v33 }
  0x3a   :  { %v70_v35 = vmul.f32 1.442695, %v69_v34  ;;  %v75_v39 = vsub.f32 0.0, %v69_v34 }
  0x3c   :  { %106 = vpow2.f32 %v70_v35 }
  0x42   :  { %v107_v36 = vpop.eup %106 }
  0x43   :  { %v72_v37 = vsub.f32 1.0, %v107_v36 }
  0x45   :  { %v73_v38 = vmul.f32 %v72_v37, %v72_v37 }
  0x47   :  { %v74_v40 = vmul.f32 0.25, %v73_v38 }
  0x49   :  { %v76_v41 = vmul.f32 %v75_v39, %v74_v40 }
  0x4b   :  { %v77_v42 = vsel %vm32_vm0, %v76_v41, 0.0 }
  0x4c   :  { %v79_v43 = vsel %vm78_vm3, %v77_v42, 0.0 }
  0x4d   :  { %80 = vadd.xlane.f32.xlu0 %v79_v43 }
  0xc0   :  { %v81_v44 = vpop.xlane.xlu0 %80 }
  0xc1   :  { %v82_v45 = vrot.slane %v81_v44, 4 }
  0xc3   :  { %v83_v46 = vadd.f32 %v82_v45, %v81_v44 }
  0xc5   :  { %v84_v47 = vrot.slane %v83_v46, 2 }
  0xc7   :  { %v85_v48 = vadd.f32 %v84_v47, %v83_v46 }
  0xc9   :  { %v86_v49 = vrot.slane %v85_v48, 1 }
  0xcb   :  { %v87_v50 = vadd.f32 %v86_v49, %v85_v48 }
  0xcd   :  { %98 = vpush %v87_v50 }
  0xfe   :  { %s99_s1 = spop %98 }
  0xff   :  { %v90_v51 = vstv %s99_s1 }
 0x100   :  { %v91_v52 = vsel %vm89_vm4, %v90_v51, 0.0 }
 0x101   :  { %92 = vst [vmem:[%s172_s2] sm:$0x1] %v91_v52 }
 0x102   :  { %97 = vsyncpa [#allocation3], 1 }

</bundles_post_ra>
